<compile_context>
chip_gen: v7x
topology: tpu7x:2x2x1
jax: 0.10.0
libtpu: 0.0.40
codegen_flags: <defaults>
</compile_context>

<pallas_src>
import functools

import jax
import jax.numpy as jnp
from jax import lax
from jax.experimental import pallas as pl
from jax.experimental.pallas import tpu as pltpu

LANE = 128       # TPU lane width
H = 64           # hidden width of the MLP
CHUNK = 512      # lanes per inner compute chunk (bounds vreg pressure)
MAX_TILE = 4096  # samples per grid step (lane dim); must be a multiple of CHUNK


def _silu(h):
    # x * sigmoid(x) with sigmoid(x) = 0.5*(tanh(x/2)+1): one EUP op/element.
    return h * (0.5 * jnp.tanh(0.5 * h) + 0.5)


def _mlp_kernel(xt_ref, consts_ref, w2_ref, o_ref, *, chunk, n_chunks, act_dtype):
    # xt_ref:     [2, TILE]  (row 0 = x, row 1 = t; batch on lanes)
    # consts_ref: [64, 8]    packed columns: w1x, w1t, b1, b2, w3^T, b3, 0, 0
    # w2_ref:     [64, 64]   (matmul dtype, chosen by the wrapper)
    # o_ref:      [1, TILE]
    w2 = w2_ref[...]                              # hoisted out of the chunk loop
    c = consts_ref[...]                           # [64, 8] f32
    w1x = c[:, 0:1].astype(act_dtype)             # [64, 1]
    w1t = c[:, 1:2].astype(act_dtype)
    b1 = c[:, 2:3].astype(act_dtype)
    b2 = c[:, 3:4]                                # f32 (added to f32 MXU acc)
    w3 = c[:, 4:5]                                # [64, 1] f32 ( = W3.T )
    b3 = c[0:1, 5:6]                              # [1, 1] f32

    def body(ci, carry):
        s = pl.ds(pl.multiple_of(ci * chunk, chunk), chunk)
        xr = xt_ref[0:1, s].astype(act_dtype)     # [1, chunk]
        tr = xt_ref[1:2, s].astype(act_dtype)     # [1, chunk]

        # Layer 1: Linear(2 -> 64) as two broadcast FMAs on the VPU (real K=2).
        h = _silu(w1x * xr + w1t * tr + b1)       # [64, chunk], act_dtype

        # Layer 2: Linear(64 -> 64) on the MXU, f32 accumulation.
        h2 = jnp.dot(w2, h.astype(w2.dtype),
                     preferred_element_type=jnp.float32)   # [64, chunk] f32
        h2 = _silu((h2 + b2).astype(act_dtype))   # [64, chunk], act_dtype

        # Layer 3: Linear(64 -> 1) as VPU multiply + cross-sublane (XLU) reduce.
        o = jnp.sum(h2 * w3, axis=0, keepdims=True) + b3   # [1, chunk] f32
        o_ref[:, s] = o.astype(o_ref.dtype)
        return carry

    lax.fori_loop(0, n_chunks, body, 0, unroll=True)


def _default_act_dtype():
    """bf16 activations where the VPU/EUP support it (v6e/v7x), else f32."""
    kind = jax.devices()[0].device_kind.lower()
    if ("v6" in kind) or ("v7" in kind) or ("7x" in kind):
        return jnp.bfloat16
    return jnp.float32


@functools.partial(jax.jit,
                   static_argnames=("matmul_dtype", "act_dtype", "max_tile"))
def mlp_forward(x, t, params, *, matmul_dtype=jnp.bfloat16, act_dtype=None,
                max_tile=MAX_TILE):
    """x: [N, 1], t: [N, 1] (float32). Returns [N, 1] = MLP(cat([x, t], 1))."""
    if act_dtype is None:
        act_dtype = _default_act_dtype()
    w1, b1, w2, b2, w3, b3 = params       # PyTorch layout: [out, in], [out]
    n = x.shape[0]
    assert max_tile % CHUNK == 0

    # Samples per grid step (lane axis): a multiple of CHUNK, capped at max_tile.
    tile = min(max_tile, pl.cdiv(n, CHUNK) * CHUNK)
    # Keep >= 2 grid steps when possible so the "parallel" axis can be split
    # across v7x's two TensorCores.
    if pl.cdiv(n, tile) < 2 and tile > CHUNK:
        tile = pl.cdiv(pl.cdiv(n, 2), CHUNK) * CHUNK
    n_pad = pl.cdiv(n, tile) * tile
    grid = (n_pad // tile,)
    n_chunks = tile // CHUNK

    # One lane-dense input slab [2, n_pad]: row 0 = x, row 1 = t. Reshapes are
    # metadata-only; only the tail (if any) is padded.
    xt = jnp.concatenate([x.reshape(1, n), t.reshape(1, n)], axis=0)
    if n_pad != n:
        xt = jnp.pad(xt, ((0, 0), (0, n_pad - n)))
    xt = xt.astype(jnp.float32)

    # Pack the tiny per-feature constants into one [64, 8] array (one DMA).
    consts = jnp.zeros((H, 8), jnp.float32)
    consts = consts.at[:, 0].set(w1[:, 0])          # w1 column for x
    consts = consts.at[:, 1].set(w1[:, 1])          # w1 column for t
    consts = consts.at[:, 2].set(b1)
    consts = consts.at[:, 3].set(b2)
    consts = consts.at[:, 4].set(w3[0, :])          # W3.T
    consts = consts.at[:, 5].set(b3[0])             # broadcast scalar

    w2_c = w2.astype(matmul_dtype)                  # bf16 by default (MXU-native)

    kernel = functools.partial(_mlp_kernel, chunk=CHUNK, n_chunks=n_chunks,
                               act_dtype=act_dtype)

    out = pl.pallas_call(
        kernel,
        out_shape=jax.ShapeDtypeStruct((1, n_pad), jnp.float32),
        grid=grid,
        in_specs=[
            pl.BlockSpec((2, tile), lambda i: (0, i)),   # packed x/t rows
            pl.BlockSpec((H, 8), lambda i: (0, 0)),      # packed constants
            pl.BlockSpec((H, H), lambda i: (0, 0)),      # w2
        ],
        out_specs=pl.BlockSpec((1, tile), lambda i: (0, i)),
        compiler_params=pltpu.CompilerParams(
            dimension_semantics=("parallel",)),          # split batch over TCs
        cost_estimate=pl.CostEstimate(
            flops=(2 * 2 * H + 2 * H * H + 2 * H) * n_pad,
            transcendentals=2 * H * n_pad,
            bytes_accessed=12 * n_pad + 4 * (H * 8 + H * H)),
    )(xt, consts, w2_c)

    return out[0, :n].reshape(n, 1)


def init_params(key):
    """Deterministic init matching torch nn.Linear shapes/init ([out, in])."""
    ks = jax.random.split(key, 6)

    def lin(kw, kb, fan_in, fan_out):
        bound = 1.0 / jnp.sqrt(fan_in)
        w = jax.random.uniform(kw, (fan_out, fan_in), jnp.float32, -bound, bound)
        b = jax.random.uniform(kb, (fan_out,), jnp.float32, -bound, bound)
        return w, b

    w1, b1 = lin(ks[0], ks[1], 2, H)
    w2, b2 = lin(ks[2], ks[3], H, H)
    w3, b3 = lin(ks[4], ks[5], H, 1)
    return (w1, b1, w2, b2, w3, b3)


def _reference(x, t, params):
    w1, b1, w2, b2, w3, b3 = params
    h = jnp.concatenate([x, t], axis=1)
    h = jax.nn.silu(h @ w1.T + b1)
    h = jax.nn.silu(h @ w2.T + b2)
    return h @ w3.T + b3


if __name__ == "__main__":
    key = jax.random.PRNGKey(0)
    kx, kt, kp = jax.random.split(key, 3)
    params = init_params(kp)

    # Small, spec-consistent shapes: batch of 8 (x, t) scalar pairs.
    N = 8
    x = jax.random.normal(kx, (N, 1), jnp.float32)
    t = jax.random.uniform(kt, (N, 1), jnp.float32)

    # Full-precision path: must match the reference tightly.
    out = jax.block_until_ready(
        mlp_forward(x, t, params, matmul_dtype=jnp.float32,
                    act_dtype=jnp.float32))
    ref = _reference(x, t, params)
    assert out.shape == (N, 1)
    assert jnp.allclose(out, ref, atol=1e-5, rtol=1e-5), (
        f"f32 max abs err {jnp.max(jnp.abs(out - ref))}")

    # Multi-tile grid path (exercises pipelining + batch padding/unpadding
    # and the >=2-step grid clamp for the parallel axis).
    N2 = 2500
    kx2, kt2 = jax.random.split(jax.random.PRNGKey(1), 2)
    x2 = jax.random.normal(kx2, (N2, 1), jnp.float32)
    t2 = jax.random.uniform(kt2, (N2, 1), jnp.float32)
    out2 = jax.block_until_ready(
        mlp_forward(x2, t2, params, matmul_dtype=jnp.float32,
                    act_dtype=jnp.float32))
    ref2 = _reference(x2, t2, params)
    assert out2.shape == (N2, 1)
    assert jnp.allclose(out2, ref2, atol=1e-5, rtol=1e-5), (
        f"f32 grid max abs err {jnp.max(jnp.abs(out2 - ref2))}")

    # Default fast path: bf16 MXU everywhere, bf16 activations on v6e/v7x.
    out_fast = jax.block_until_ready(mlp_forward(x2, t2, params))
    assert out_fast.shape == (N2, 1)
    assert jnp.all(jnp.isfinite(out_fast))
    assert jnp.allclose(out_fast, ref2, atol=1e-1, rtol=1e-1), (
        f"bf16 max abs err {jnp.max(jnp.abs(out_fast - ref2))}")

    print("KERNEL_OK")
</pallas_src>

<mosaic_0001>
module attributes {stable_mosaic.version = 11 : i64} {
  func.func @_mlp_kernel(%arg0: i32, %arg1: memref<2x512xf32, #tpu.memory_space<vmem>>, %arg2: memref<64x8xf32, #tpu.memory_space<vmem>>, %arg3: memref<64x64xf32, #tpu.memory_space<vmem>>, %arg4: memref<1x512xf32, #tpu.memory_space<vmem>>) attributes {dimension_semantics = [#tpu.dimension_semantics<parallel>], iteration_bounds = array<i64: 1>, scalar_prefetch = 0 : i64, scratch_operands = 0 : i64, tpu.core_type = #tpu.core_type<tc>, window_params = [{transform_indices = @transform_0, window_bounds = array<i64: 2, 512>}, {pipeline_mode = #tpu.pipeline_mode<synchronous>, transform_indices = @transform_1, window_bounds = array<i64: 64, 8>}, {pipeline_mode = #tpu.pipeline_mode<synchronous>, transform_indices = @transform_2, window_bounds = array<i64: 64, 64>}, {transform_indices = @transform_3, window_bounds = array<i64: 1, 512>}]} {
    %c0 = arith.constant 0 : index
    %c0_0 = arith.constant 0 : index
    %0 = vector.load %arg3[%c0, %c0_0] : memref<64x64xf32, #tpu.memory_space<vmem>>, vector<64x64xf32>
    %c0_1 = arith.constant 0 : index
    %c0_2 = arith.constant 0 : index
    %1 = vector.load %arg2[%c0_1, %c0_2] : memref<64x8xf32, #tpu.memory_space<vmem>>, vector<64x8xf32>
    %2 = vector.extract_strided_slice %1 {offsets = [0, 0], sizes = [64, 1], strides = [1, 1]} : vector<64x8xf32> to vector<64x1xf32>
    %3 = vector.extract_strided_slice %1 {offsets = [0, 1], sizes = [64, 1], strides = [1, 1]} : vector<64x8xf32> to vector<64x1xf32>
    %4 = vector.extract_strided_slice %1 {offsets = [0, 2], sizes = [64, 1], strides = [1, 1]} : vector<64x8xf32> to vector<64x1xf32>
    %5 = vector.extract_strided_slice %1 {offsets = [0, 3], sizes = [64, 1], strides = [1, 1]} : vector<64x8xf32> to vector<64x1xf32>
    %6 = vector.extract_strided_slice %1 {offsets = [0, 4], sizes = [64, 1], strides = [1, 1]} : vector<64x8xf32> to vector<64x1xf32>
    %7 = vector.extract_strided_slice %1 {offsets = [0, 5], sizes = [1, 1], strides = [1, 1]} : vector<64x8xf32> to vector<1x1xf32>
    %c0_i32 = arith.constant 0 : i32
    %c512_i32 = arith.constant 512 : i32
    %8 = arith.muli %c0_i32, %c512_i32 : i32
    %9 = tpu.assume_multiple %8, 512 : i32
    %c0_3 = arith.constant 0 : index
    %10 = arith.index_cast %9 : i32 to index
    %11 = vector.load %arg1[%c0_3, %10] : memref<2x512xf32, #tpu.memory_space<vmem>>, vector<1x512xf32>
    %c1 = arith.constant 1 : index
    %12 = arith.index_cast %9 : i32 to index
    %13 = vector.load %arg1[%c1, %12] : memref<2x512xf32, #tpu.memory_space<vmem>>, vector<1x512xf32>
    %14 = vector.broadcast %2 : vector<64x1xf32> to vector<64x512xf32>
    %15 = vector.broadcast %11 : vector<1x512xf32> to vector<64x512xf32>
    %16 = arith.mulf %14, %15 : vector<64x512xf32>
    %17 = vector.broadcast %3 : vector<64x1xf32> to vector<64x512xf32>
    %18 = vector.broadcast %13 : vector<1x512xf32> to vector<64x512xf32>
    %19 = arith.mulf %17, %18 : vector<64x512xf32>
    %20 = arith.addf %16, %19 : vector<64x512xf32>
    %21 = vector.broadcast %4 : vector<64x1xf32> to vector<64x512xf32>
    %22 = arith.addf %20, %21 : vector<64x512xf32>
    %cst = arith.constant 5.000000e-01 : f32
    %23 = vector.broadcast %cst : f32 to vector<64x512xf32>
    %24 = arith.mulf %23, %22 : vector<64x512xf32>
    %25 = math.tanh %24 : vector<64x512xf32>
    %cst_4 = arith.constant 5.000000e-01 : f32
    %26 = vector.broadcast %cst_4 : f32 to vector<64x512xf32>
    %27 = arith.mulf %26, %25 : vector<64x512xf32>
    %cst_5 = arith.constant 5.000000e-01 : f32
    %28 = vector.broadcast %cst_5 : f32 to vector<64x512xf32>
    %29 = arith.addf %27, %28 : vector<64x512xf32>
    %30 = arith.mulf %22, %29 : vector<64x512xf32>
    %cst_6 = arith.constant dense<0.000000e+00> : vector<64x512xf32>
    %31 = tpu.matmul %0, %30, %cst_6 {dimension_numbers = #tpu.dot_dimension_numbers<[1], [0], [0], [1], [0, 0, 1, 1], [], []>} : vector<64x64xf32>, vector<64x512xf32>, vector<64x512xf32> -> vector<64x512xf32>
    %32 = vector.broadcast %5 : vector<64x1xf32> to vector<64x512xf32>
    %33 = arith.addf %31, %32 : vector<64x512xf32>
    %cst_7 = arith.constant 5.000000e-01 : f32
    %34 = vector.broadcast %cst_7 : f32 to vector<64x512xf32>
    %35 = arith.mulf %34, %33 : vector<64x512xf32>
    %36 = math.tanh %35 : vector<64x512xf32>
    %cst_8 = arith.constant 5.000000e-01 : f32
    %37 = vector.broadcast %cst_8 : f32 to vector<64x512xf32>
    %38 = arith.mulf %37, %36 : vector<64x512xf32>
    %cst_9 = arith.constant 5.000000e-01 : f32
    %39 = vector.broadcast %cst_9 : f32 to vector<64x512xf32>
    %40 = arith.addf %38, %39 : vector<64x512xf32>
    %41 = arith.mulf %33, %40 : vector<64x512xf32>
    %42 = vector.broadcast %6 : vector<64x1xf32> to vector<64x512xf32>
    %43 = arith.mulf %41, %42 : vector<64x512xf32>
    %cst_10 = arith.constant dense<0.000000e+00> : vector<512xf32>
    %44 = vector.multi_reduction <add>, %43, %cst_10 [0] : vector<64x512xf32> to vector<512xf32>
    %45 = vector.shape_cast %44 : vector<512xf32> to vector<1x512xf32>
    %46 = vector.broadcast %7 : vector<1x1xf32> to vector<1x512xf32>
    %47 = arith.addf %45, %46 : vector<1x512xf32>
    %c0_11 = arith.constant 0 : index
    %48 = arith.index_cast %9 : i32 to index
    %49 = vector.load %arg4[%c0_11, %48] : memref<1x512xf32, #tpu.memory_space<vmem>>, vector<1x512xf32>
    tpu.vector_store %arg4[%c0_11, %48], %47 {strides = array<i32>} : memref<1x512xf32, #tpu.memory_space<vmem>>, vector<1x512xf32>,
    %c1_i32 = arith.constant 1 : i32
    return
  }
  func.func @transform_0(%arg0: i32) -> (i32, i32) {
    %c0_i32 = arith.constant 0 : i32
    %c0_i32_0 = arith.constant 0 : i32
    return %c0_i32, %arg0 : i32, i32
  }
  func.func @transform_1(%arg0: i32) -> (i32, i32) {
    %c0_i32 = arith.constant 0 : i32
    %c0_i32_0 = arith.constant 0 : i32
    %c0_i32_1 = arith.constant 0 : i32
    return %c0_i32, %c0_i32_0 : i32, i32
  }
  func.func @transform_2(%arg0: i32) -> (i32, i32) {
    %c0_i32 = arith.constant 0 : i32
    %c0_i32_0 = arith.constant 0 : i32
    %c0_i32_1 = arith.constant 0 : i32
    return %c0_i32, %c0_i32_0 : i32, i32
  }
  func.func @transform_3(%arg0: i32) -> (i32, i32) {
    %c0_i32 = arith.constant 0 : i32
    %c0_i32_0 = arith.constant 0 : i32
    return %c0_i32, %arg0 : i32, i32
  }
}

</mosaic_0001>

<bundles_post_ra>
// kernel: mlp_forward.1
= control target key start
LH: loop header
LB: loop body
LE: loop exit
PB: predicated region body
PF: predicated region fallthrough
CT: control target
= control target key end

     0   :  { %v1275_v0 = vmov 1   ;;  %v1276_v1 = vmov 0   ;;  %v1277_v7 = vmov 2   ;;  %v1991_v11 = vmov 0.0   ;;  %s1986_s1 = inlined_call_operand.vmem [shape: f32[64,8], index: 1, kind: input, shape index: {}]   ;;  %s1987_s0 = inlined_call_operand.vmem [shape: f32[2,512], index: 0, kind: input, shape index: {}]   ;;  %s1988_s2 = inlined_call_operand.vmem [shape: f32[64,64], index: 2, kind: input, shape index: {}]   ;;  %s1989_s3 = inlined_call_operand.vmem [shape: f32[1,512], index: 3, kind: output, shape index: {}]  }
   0x1   :  { %1130 = vset.pattern.permute.xlu1 %v1275_v0  ;;  %1129 = vset.pattern.permute.xlu0 %v1276_v1  ;;  %v1306_v2 = vld [vmem:[%s1986_s1] sm:$0xff]  ;;  %v1313_v3 = vld [vmem:[%s1986_s1 + $0x8] sm:$0xff]  ;;  %v1320_v4 = vld [vmem:[%s1986_s1 + $0x10] sm:$0xff]  ;;  %v1990_v12 = vlaneseq  ;;  %v1279_v17 = vmov 3   ;;  %vm499_vm0 = vcmask 523264  }
   0x2   :  { %127 = vperm.xlu1 %1130, %v1306_v2   ;;  %35 = vperm.xlu0 %1129, %v1306_v2   ;;  %v1325_v5 = vld [vmem:[%s1986_s1 + $0x18] sm:$0xff]  ;;  %v1334_v6 = vld [vmem:[%s1986_s1 + $0x20] sm:$0xff]  ;;  %v1340_v8 = vld [vmem:[%s1986_s1 + $0x30] sm:$0xff] }
   0x3   :  { %v1348_v9 = vld [vmem:[%s1986_s1 + $0x28] sm:$0xff]  ;;  %v1360_v10 = vld [vmem:[%s1986_s1 + $0x38] sm:$0xff]  ;;  %588 = vmatprep.mubr.f32.mxu0 %v1991_v11  ;;  %701 = vmatprep.mubr.f32.mxu1 %v1991_v11  ;;  %v1370_v13 = vshrl.u32 %v1990_v12, 7  ;;  %v1072_v21 = vld [vmem:[%s1987_s0 + $0x1] ss:$2 sm:$0xf] }
   0x4   :  { %v30_v22 = vld [vmem:[%s1987_s0] ss:$2 sm:$0xf] }
   0x5   :  { %1996 = vst [vmem:[#allocation2_spill] sm:$0xff] %v1370_v13  ;;  %v76_v16 = vsub.s32 0, %v1370_v13  ;;  %v80_v18 = vsub.s32 1, %v1370_v13  ;;  %v84_v19 = vsub.s32 2, %v1370_v13  ;;  %v88_v20 = vsub.s32 3, %v1370_v13 }
   0x6   :  { %131 = vperm.xlu1 %1130, %v1313_v3   ;;  %40 = vperm.xlu0 %1129, %v1313_v3  }
   0x7   :  { %v1384_v25 = vrot.slane %v1072_v21, %v76_v16  ;;  %v1386_v26 = vrot.slane %v1072_v21, %v80_v18  ;;  %v1388_v27 = vrot.slane %v1072_v21, %v84_v19  ;;  %v1390_v28 = vrot.slane %v1072_v21, %v88_v20 }
   0x8   :  { %v1392_v29 = vrot.slane %v30_v22, %v76_v16  ;;  %v1394_v30 = vrot.slane %v30_v22, %v80_v18  ;;  %v1396_v31 = vrot.slane %v30_v22, %v84_v19  ;;  %v1398_v32 = vrot.slane %v30_v22, %v88_v20 }
   0x9   :  { %v1280_v18 = vmov 4  }
   0xa   :  { %1131 = vset.pattern.permute.xlu1 %v1276_v1  ;;  %45 = vperm.xlu0 %1129, %v1320_v4  }
   0xb   :  { %50 = vperm.xlu1 %1131, %v1325_v5  }
   0xe   :  { %1132 = vset.pattern.permute.xlu0 %v1275_v0 }
   0xf   :  { %1133 = vset.pattern.permute.xlu1 %v1275_v0  ;;  %135 = vperm.xlu0 %1132, %v1320_v4  }
  0x10   :  { %139 = vperm.xlu1 %1133, %v1325_v5  }
  0x13   :  { %143 = vperm.xlu0 %1132, %v1334_v6  }
  0x14   :  { %1134 = vset.pattern.permute.xlu1 %v1277_v7 }
  0x15   :  { %244 = vperm.xlu1 %1134, %v1306_v2  }
  0x17   :  { %151 = vperm.xlu0 %1132, %v1340_v8  }
  0x19   :  { %1135 = vset.pattern.permute.xlu1 %v1276_v1 }
  0x1a   :  { %55 = vperm.xlu1 %1135, %v1334_v6  }
  0x1b   :  { %1139 = vset.pattern.permute.xlu0 %v1277_v7 }
  0x1c   :  { %248 = vperm.xlu0 %1139, %v1313_v3  }
  0x1e   :  { %60 = vperm.xlu1 %1135, %v1348_v9  }
  0x20   :  { %256 = vperm.xlu0 %1139, %v1325_v5  }
  0x22   :  { %1136 = vset.pattern.permute.xlu1 %v1275_v0 }
  0x23   :  { %147 = vperm.xlu1 %1136, %v1348_v9  }
  0x24   :  { %264 = vperm.xlu0 %1139, %v1348_v9  }
  0x27   :  { %1137 = vset.pattern.permute.xlu1 %v1277_v7 }
  0x28   :  { %252 = vperm.xlu1 %1137, %v1320_v4   ;;  %1142 = vset.pattern.permute.xlu0 %v1279_v17 }
  0x29   :  { %468 = vperm.xlu0 %1142, %v1306_v2  }
  0x2c   :  { %1138 = vset.pattern.permute.xlu1 %v1276_v1 }
  0x2d   :  { %65 = vperm.xlu1 %1138, %v1340_v8   ;;  %480 = vperm.xlu0 %1142, %v1325_v5  }
  0x31   :  { %70 = vperm.xlu1 %1138, %v1360_v10   ;;  %488 = vperm.xlu0 %1142, %v1348_v9  }
  0x35   :  { %1140 = vset.pattern.permute.xlu1 %v1275_v0  ;;  %496 = vperm.xlu0 %1142, %v1360_v10  }
  0x36   :  { %155 = vperm.xlu1 %1140, %v1360_v10  }
  0x39   :  { %1145 = vset.pattern.permute.xlu0 %v1280_v18 }
  0x3a   :  { %1141 = vset.pattern.permute.xlu1 %v1277_v7  ;;  %915 = vperm.xlu0 %1145, %v1313_v3  }
  0x3b   :  { %260 = vperm.xlu1 %1141, %v1334_v6  }
  0x3e   :  { %927 = vperm.xlu0 %1145, %v1334_v6  }
  0x3f   :  { %268 = vperm.xlu1 %1141, %v1340_v8  }
  0x42   :  { %935 = vperm.xlu0 %1145, %v1340_v8  }
  0x43   :  { %272 = vperm.xlu1 %1141, %v1360_v10  }
  0x47   :  { %1143 = vset.pattern.permute.xlu1 %v1279_v17 }
  0x48   :  { %472 = vperm.xlu1 %1143, %v1313_v3  }
  0x4c   :  { %476 = vperm.xlu1 %1143, %v1320_v4  }
  0x50   :  { %484 = vperm.xlu1 %1143, %v1334_v6  }
  0x54   :  { %492 = vperm.xlu1 %1143, %v1340_v8  }
  0x58   :  { %1144 = vset.pattern.permute.xlu1 %v1280_v18 }
  0x59   :  { %911 = vperm.xlu1 %1144, %v1306_v2  }
  0x5d   :  { %919 = vperm.xlu1 %1144, %v1320_v4  }
  0x61   :  { %923 = vperm.xlu1 %1144, %v1325_v5  }
  0x65   :  { %931 = vperm.xlu1 %1144, %v1348_v9  }
  0x69   :  { %939 = vperm.xlu1 %1144, %v1360_v10  }
  0x81   :  { %v128_v14 = vpop.permute.xlu1 %127  ;;  %v36_v15 = vpop.permute.xlu0 %35 }
  0x82   :  { %v179_v34 = vmul.f32 %v1384_v25, %v128_v14  ;;  %v180_v36 = vmul.f32 %v1386_v26, %v128_v14  ;;  %v181_v37 = vmul.f32 %v1388_v27, %v128_v14  ;;  %v182_v38 = vmul.f32 %v1390_v28, %v128_v14 }
  0x83   :  { %v94_v39 = vmul.f32 %v1392_v29, %v36_v15  ;;  %v95_v40 = vmul.f32 %v1394_v30, %v36_v15  ;;  %v96_v41 = vmul.f32 %v1396_v31, %v36_v15  ;;  %v97_v42 = vmul.f32 %v1398_v32, %v36_v15 }
  0x85   :  { %v132_v23 = vpop.permute.xlu1 %131  ;;  %v41_v24 = vpop.permute.xlu0 %40  ;;  %v212_v53 = vadd.f32 %v180_v36, %v95_v40  ;;  %v214_v54 = vadd.f32 %v182_v38, %v97_v42  ;;  %v211_v55 = vadd.f32 %v179_v34, %v94_v39  ;;  %v213_v56 = vadd.f32 %v181_v37, %v96_v41 }
  0x86   :  { %v183_v43 = vmul.f32 %v1384_v25, %v132_v23  ;;  %v184_v44 = vmul.f32 %v1386_v26, %v132_v23  ;;  %v185_v45 = vmul.f32 %v1388_v27, %v132_v23  ;;  %v186_v46 = vmul.f32 %v1390_v28, %v132_v23 }
  0x87   :  { %v98_v47 = vmul.f32 %v1392_v29, %v41_v24  ;;  %v99_v48 = vmul.f32 %v1394_v30, %v41_v24  ;;  %v100_v49 = vmul.f32 %v1396_v31, %v41_v24  ;;  %v101_v50 = vmul.f32 %v1398_v32, %v41_v24 }
  0x89   :  { %v46_v33 = vpop.permute.xlu0 %45  ;;  %v216_v58 = vadd.f32 %v184_v44, %v99_v48  ;;  %v218_v59 = vadd.f32 %v186_v46, %v101_v50  ;;  %v1422_v60 = vadd.f32 %v183_v43, %v98_v47  ;;  %v1424_v61 = vadd.f32 %v185_v45, %v100_v49 }
  0x8a   :  { %v51_v35 = vpop.permute.xlu1 %50  ;;  %v102_v62 = vmul.f32 %v1392_v29, %v46_v33  ;;  %v103_v63 = vmul.f32 %v1394_v30, %v46_v33  ;;  %v104_v0 = vmul.f32 %v1396_v31, %v46_v33  ;;  %v105_v7 = vmul.f32 %v1398_v32, %v46_v33 }
  0x8b   :  { %v106_v23 = vmul.f32 %v1392_v29, %v51_v35  ;;  %v107_v24 = vmul.f32 %v1394_v30, %v51_v35  ;;  %v108_v37 = vmul.f32 %v1396_v31, %v51_v35  ;;  %v109_v38 = vmul.f32 %v1398_v32, %v51_v35 }
  0x8e   :  { %v136_v51 = vpop.permute.xlu0 %135 }
  0x8f   :  { %v140_v52 = vpop.permute.xlu1 %139  ;;  %v187_v1 = vmul.f32 %v1384_v25, %v136_v51  ;;  %v188_v14 = vmul.f32 %v1386_v26, %v136_v51  ;;  %v189_v15 = vmul.f32 %v1388_v27, %v136_v51  ;;  %v190_v16 = vmul.f32 %v1390_v28, %v136_v51 }
  0x90   :  { %v191_v19 = vmul.f32 %v1384_v25, %v140_v52  ;;  %v192_v20 = vmul.f32 %v1386_v26, %v140_v52  ;;  %v193_v21 = vmul.f32 %v1388_v27, %v140_v52  ;;  %v194_v33 = vmul.f32 %v1390_v28, %v140_v52 }
  0x91   :  { %v1447_v39 = vadd.f32 %v187_v1, %v102_v62  ;;  %v1452_v41 = vadd.f32 %v188_v14, %v103_v63  ;;  %v1454_v42 = vadd.f32 %v189_v15, %v104_v0  ;;  %v1456_v43 = vadd.f32 %v190_v16, %v105_v7 }
  0x92   :  { %v144_v57 = vpop.permute.xlu0 %143  ;;  %v223_v46 = vadd.f32 %v191_v19, %v106_v23  ;;  %v224_v47 = vadd.f32 %v192_v20, %v107_v24  ;;  %v225_v48 = vadd.f32 %v193_v21, %v108_v37  ;;  %v226_v50 = vadd.f32 %v194_v33, %v109_v38 }
  0x93   :  { %v195_v35 = vmul.f32 %v1384_v25, %v144_v57  ;;  %v196_v3 = vmul.f32 %v1386_v26, %v144_v57  ;;  %v1466_v52 = vmul.f32 %v1388_v27, %v144_v57 }
  0x94   :  { %v245_v17 = vpop.permute.xlu1 %244 }
  0x95   :  { %v1437_v22 = vadd.f32 %v245_v17, %v212_v53  ;;  %v1443_v36 = vadd.f32 %v245_v17, %v214_v54  ;;  %v1449_v40 = vadd.f32 %v245_v17, %v211_v55  ;;  %v1459_v49 = vadd.f32 %v245_v17, %v213_v56 }
  0x96   :  { %v152_v34 = vpop.permute.xlu0 %151  ;;  %v1469_v53 = vmul.f32 %v1390_v28, %v144_v57 }
  0x97   :  { %v308_v44 = vmul.f32 0.5, %v1437_v22  ;;  %v310_v51 = vmul.f32 0.5, %v1443_v36  ;;  %v307_v55 = vmul.f32 0.5, %v1449_v40  ;;  %v1474_v4 = vmul.f32 %v1384_v25, %v152_v34 }
  0x98   :  { %v1477_v56 = vmul.f32 %v1386_v26, %v152_v34  ;;  %v1480_v62 = vmul.f32 %v1388_v27, %v152_v34  ;;  %v1485_v57 = vmul.f32 %v1390_v28, %v152_v34  ;;  %v1490_v6 = vmul.f32 0.5, %v1459_v49 }
  0x99   :  { %v56_v45 = vpop.permute.xlu1 %55  ;;  %1147 = vtanh.f32 %v308_v44 }
  0x9a   :  { %v110_v0 = vmul.f32 %v1392_v29, %v56_v45  ;;  %v111_v1 = vmul.f32 %v1394_v30, %v56_v45  ;;  %v1494_v14 = vmul.f32 %v1396_v31, %v56_v45  ;;  %v1497_v15 = vmul.f32 %v1398_v32, %v56_v45 }
  0x9b   :  { %v249_v54 = vpop.permute.xlu0 %248  ;;  %1149 = vtanh.f32 %v310_v51 }
  0x9c   :  { %v1482_v63 = vadd.f32 %v249_v54, %v216_v58  ;;  %v1499_v58 = vadd.f32 %v249_v54, %v218_v59  ;;  %v1503_v18 = vadd.f32 %v249_v54, %v1422_v60  ;;  %1151 = vtanh.f32 %v307_v55 }
  0x9d   :  { %v61_v7 = vpop.permute.xlu1 %60  ;;  %v1506_v19 = vadd.f32 %v249_v54, %v1424_v61  ;;  %v1532_v51 = vadd.f32 %v196_v3, %v111_v1 }
  0x9e   :  { %v312_v17 = vmul.f32 0.5, %v1482_v63  ;;  %v114_v23 = vmul.f32 %v1392_v29, %v61_v7  ;;  %v115_v24 = vmul.f32 %v1394_v30, %v61_v7  ;;  %v116_v60 = vmul.f32 %v1396_v31, %v61_v7 }
  0x9f   :  { %v257_v16 = vpop.permute.xlu0 %256  ;;  %v117_v9 = vmul.f32 %v1398_v32, %v61_v7  ;;  %v314_v7 = vmul.f32 0.5, %v1499_v58 }
  0xa0   :  { %v1509_v5 = vadd.f32 %v257_v16, %v223_v46  ;;  %v1511_v20 = vadd.f32 %v257_v16, %v224_v47  ;;  %v1513_v21 = vadd.f32 %v257_v16, %v225_v48  ;;  %v1515_v59 = vadd.f32 %v257_v16, %v226_v50 }
  0xa1   :  { %1153 = vtanh.f32 %v312_v17  ;;  %v1281_v47 = vmov 5   ;;  %v1530_v50 = vadd.f32 %v195_v35, %v110_v0 }
  0xa2   :  { %v319_v61 = vmul.f32 0.5, %v1509_v5  ;;  %v320_v8 = vmul.f32 0.5, %v1511_v20  ;;  %v321_v33 = vmul.f32 0.5, %v1513_v21  ;;  %v322_v34 = vmul.f32 0.5, %v1515_v59  ;;  %v148_v37 = vpop.permute.xlu1 %147  ;;  %1146 = vset.pattern.permute.xlu0 %v1281_v47 }
  0xa3   :  { %v199_v38 = vmul.f32 %v1384_v25, %v148_v37  ;;  %v200_v44 = vmul.f32 %v1386_v26, %v148_v37  ;;  %v201_v45 = vmul.f32 %v1388_v27, %v148_v37  ;;  %v202_v46 = vmul.f32 %v1390_v28, %v148_v37  ;;  %v265_v48 = vpop.permute.xlu0 %264  ;;  %1027 = vperm.xlu0 %1146, %v1306_v2   ;;  %v1148_v54 = vpop.eup %1147 }
  0xa4   :  { %1155 = vtanh.f32 %v319_v61  ;;  %v372_v47 = vmul.f32 0.5, %v1148_v54 }
  0xa5   :  { %1157 = vtanh.f32 %v320_v8  ;;  %v231_v55 = vadd.f32 %v199_v38, %v114_v23  ;;  %v232_v16 = vadd.f32 %v200_v44, %v115_v24  ;;  %v233_v17 = vadd.f32 %v201_v45, %v116_v60  ;;  %v1150_v0 = vpop.eup %1149 }
  0xa6   :  { %1159 = vtanh.f32 %v321_v33  ;;  %v234_v37 = vadd.f32 %v202_v46, %v117_v9  ;;  %v1152_v60 = vpop.eup %1151  ;;  %v311_v38 = vmul.f32 0.5, %v1503_v18  ;;  %v313_v45 = vmul.f32 0.5, %v1506_v19 }
  0xa7   :  { %1161 = vtanh.f32 %v322_v34  ;;  %v1537_v61 = vadd.f32 %v265_v48, %v231_v55  ;;  %v1539_v35 = vadd.f32 %v265_v48, %v232_v16  ;;  %v1541_v3 = vadd.f32 %v265_v48, %v233_v17  ;;  %v253_v2 = vpop.permute.xlu1 %252 }
  0xa8   :  { %v1543_v1 = vadd.f32 %v265_v48, %v234_v37  ;;  %v1546_v23 = vadd.f32 %v253_v2, %v1447_v39  ;;  %v1549_v10 = vadd.f32 %v253_v2, %v1452_v41  ;;  %v1552_v24 = vadd.f32 %v253_v2, %v1454_v42 }
  0xa9   :  { %1997 = vst [vmem:[#allocation3_spill] sm:$0xff] %v1541_v3  ;;  %v327_v8 = vmul.f32 0.5, %v1537_v61  ;;  %v328_v33 = vmul.f32 0.5, %v1539_v35  ;;  %v329_v34 = vmul.f32 0.5, %v1541_v3  ;;  %v1560_v39 = vadd.f32 %v253_v2, %v1456_v43 }
  0xaa   :  { %1998 = vst [vmem:[#allocation4_spill] sm:$0xff] %v1543_v1  ;;  %v330_v44 = vmul.f32 0.5, %v1543_v1  ;;  %v315_v41 = vmul.f32 0.5, %v1546_v23  ;;  %v316_v46 = vmul.f32 0.5, %v1549_v10  ;;  %v317_v9 = vmul.f32 0.5, %v1552_v24 }
  0xab   :  { %v1154_v42 = vpop.eup %1153  ;;  %1163 = vtanh.f32 %v327_v8  ;;  %v404_v48 = vadd.f32 0.5, %v372_v47  ;;  %v374_v16 = vmul.f32 0.5, %v1150_v0  ;;  %v371_v17 = vmul.f32 0.5, %v1152_v60 }
  0xac   :  { %1165 = vtanh.f32 %v328_v33  ;;  %v66_v54 = vpop.permute.xlu1 %65  ;;  %v376_v55 = vmul.f32 0.5, %v1154_v42  ;;  %v318_v8 = vmul.f32 0.5, %v1560_v39  ;;  %v1572_v47 = vadd.f32 %v1466_v52, %v1494_v14 }
  0xad   :  { %1167 = vtanh.f32 %v329_v34  ;;  %v118_v43 = vmul.f32 %v1392_v29, %v66_v54  ;;  %v119_v37 = vmul.f32 %v1394_v30, %v66_v54  ;;  %v120_v2 = vmul.f32 %v1396_v31, %v66_v54 }
  0xae   :  { %v1156_v12 = vpop.eup %1155  ;;  %1169 = vtanh.f32 %v330_v44  ;;  %v408_v11 = vadd.f32 0.5, %v376_v55  ;;  %v121_v0 = vmul.f32 %v1398_v32, %v66_v54  ;;  %v436_v60 = vmul.f32 %v404_v48, %v1437_v22 }
  0xaf   :  { %v1158_v33 = vpop.eup %1157  ;;  %1171 = vtanh.f32 %v315_v41  ;;  %v230_v34 = vadd.f32 %v1469_v53, %v1497_v15  ;;  %v406_v3 = vadd.f32 0.5, %v374_v16  ;;  %v403_v55 = vadd.f32 0.5, %v371_v17 }
  0xb0   :  { %v1160_v42 = vpop.eup %1159  ;;  %1173 = vtanh.f32 %v316_v46  ;;  %v71_v13 = vpop.permute.xlu1 %70  ;;  %v440_v44 = vmul.f32 %v408_v11, %v1482_v63  ;;  %v1580_v52 = vadd.f32 %v1474_v4, %v118_v43  ;;  %v1583_v14 = vadd.f32 %v1477_v56, %v119_v37 }
  0xb1   :  { %v1162_v1 = vpop.eup %1161  ;;  %1175 = vtanh.f32 %v317_v9  ;;  %v1586_v22 = vadd.f32 %v1480_v62, %v120_v2  ;;  %v122_v53 = vmul.f32 %v1392_v29, %v71_v13  ;;  %v123_v15 = vmul.f32 %v1394_v30, %v71_v13 }
  0xb2   :  { %1177 = vtanh.f32 %v318_v8  ;;  %v1089_v41 = vpack.c.bf16 %v440_v44, %v436_v60  ;;  %v124_v11 = vmul.f32 %v1396_v31, %v71_v13  ;;  %v125_v63 = vmul.f32 %v1398_v32, %v71_v13 }
  0xb3   :  { %1179 = vtanh.f32 %v314_v7  ;;  %v384_v46 = vmul.f32 0.5, %v1158_v33  ;;  %v386_v4 = vmul.f32 0.5, %v1162_v1  ;;  %v383_v56 = vmul.f32 0.5, %v1156_v12 }
  0xb4   :  { %1090 = vmatprep.subr.bf16.mxu0 %v1089_v41  ;;  %1181 = vtanh.f32 %v311_v38  ;;  %v385_v9 = vmul.f32 0.5, %v1160_v42  ;;  %v1593_v62 = vmul.f32 %v406_v3, %v1443_v36  ;;  %v1596_v29 = vmul.f32 %v403_v55, %v1449_v40 }
  0xb5   :  { %v1164_v48 = vpop.eup %1163  ;;  %1183 = vtanh.f32 %v1490_v6  ;;  %v156_v30 = vpop.permute.xlu1 %155  ;;  %v416_v31 = vadd.f32 0.5, %v384_v46  ;;  %v238_v3 = vadd.f32 %v1485_v57, %v121_v0  ;;  %v418_v40 = vadd.f32 0.5, %v386_v4 }
  0xb6   :  { %v1166_v54 = vpop.eup %1165  ;;  %1185 = vtanh.f32 %v313_v45  ;;  %v207_v13 = vmul.f32 %v1384_v25, %v156_v30  ;;  %v208_v32 = vmul.f32 %v1386_v26, %v156_v30  ;;  %v209_v12 = vmul.f32 %v1388_v27, %v156_v30 }
  0xb7   :  { %v1602_v7 = vpop.eup %1167  ;;  %v210_v36 = vmul.f32 %v1390_v28, %v156_v30  ;;  %v415_v1 = vadd.f32 0.5, %v383_v56  ;;  %v1607_v6 = vmul.f32 %v416_v31, %v1511_v20  ;;  %v417_v16 = vadd.f32 0.5, %v385_v9 }
  0xb8   :  { %v1170_v38 = vpop.eup %1169  ;;  %v1609_v45 = vadd.f32 %v207_v13, %v122_v53  ;;  %v1611_v25 = vadd.f32 %v208_v32, %v123_v15  ;;  %v1614_v27 = vmul.f32 %v418_v40, %v1515_v59  ;;  %v1619_v28 = vadd.f32 %v209_v12, %v124_v11 }
  0xb9   :  { %v1172_v26 = vpop.eup %1171  ;;  %v1617_v17 = vmul.f32 %v415_v1, %v1509_v5  ;;  %v1621_v57 = vadd.f32 %v210_v36, %v125_v63  ;;  %v1624_v2 = vmul.f32 %v417_v16, %v1513_v21  ;;  %v1626_v8 = vmul.f32 0.5, %v1166_v54 }
  0xba   :  { %v1174_v43 = vpop.eup %1173  ;;  %v261_v37 = vpop.permute.xlu1 %260  ;;  %v379_v20 = vmul.f32 0.5, %v1172_v26  ;;  %v1628_v33 = vmul.f32 0.5, %v1170_v38  ;;  %v1641_v15 = vmul.f32 0.5, %v1164_v48 }
  0xbb   :  { %v1176_v0 = vpop.eup %1175  ;;  %v1631_v59 = vadd.f32 %v261_v37, %v1530_v50  ;;  %v1634_v5 = vadd.f32 %v261_v37, %v1532_v51  ;;  %v1637_v60 = vadd.f32 %v261_v37, %v1572_v47  ;;  %v1639_v42 = vadd.f32 %v261_v37, %v230_v34 }
  0xbc   :  { %v1178_v44 = vpop.eup %1177  ;;  %v380_v55 = vmul.f32 0.5, %v1174_v43  ;;  %v411_v21 = vadd.f32 0.5, %v379_v20  ;;  %v381_v53 = vmul.f32 0.5, %v1176_v0 }
  0xbd   :  { %v1180_v41 = vpop.eup %1179  ;;  %v323_v11 = vmul.f32 0.5, %v1631_v59  ;;  %v324_v50 = vmul.f32 0.5, %v1634_v5  ;;  %v325_v63 = vmul.f32 0.5, %v1637_v60  ;;  %v326_v51 = vmul.f32 0.5, %v1639_v42 }
  0xbe   :  { %v1182_v46 = vpop.eup %1181  ;;  %v378_v47 = vmul.f32 0.5, %v1180_v41  ;;  %v269_v4 = vpop.permute.xlu1 %268  ;;  %v412_v34 = vadd.f32 0.5, %v380_v55  ;;  %v382_v56 = vmul.f32 0.5, %v1178_v44  ;;  %v443_v9 = vmul.f32 %v411_v21, %v1546_v23 }
  0xbf   :  { %v1184_v30 = vpop.eup %1183  ;;  %v375_v31 = vmul.f32 0.5, %v1182_v46  ;;  %1187 = vtanh.f32 %v323_v11  ;;  %v1649_v48 = vadd.f32 %v269_v4, %v1580_v52  ;;  %v1652_v54 = vadd.f32 %v269_v4, %v1583_v14 }
  0xc0   :  { %v1186_v13 = vpop.eup %1185  ;;  %v410_v32 = vadd.f32 0.5, %v378_v47  ;;  %v373_v12 = vmul.f32 0.5, %v1184_v30  ;;  %1189 = vtanh.f32 %v324_v50  ;;  %v1655_v36 = vadd.f32 %v269_v4, %v1586_v22 }
  0xc1   :  { %v407_v40 = vadd.f32 0.5, %v375_v31  ;;  %v377_v1 = vmul.f32 0.5, %v1186_v13  ;;  %1191 = vtanh.f32 %v325_v63  ;;  %v1657_v23 = vadd.f32 %v269_v4, %v238_v3 }
  0xc2   :  { %v442_v38 = vmul.f32 %v410_v32, %v1499_v58  ;;  %v405_v16 = vadd.f32 0.5, %v373_v12  ;;  %1193 = vtanh.f32 %v326_v51  ;;  %v331_v52 = vmul.f32 0.5, %v1649_v48  ;;  %v273_v0 = vpop.permute.xlu1 %272 }
  0xc3   :  { %v439_v14 = vmul.f32 %v407_v40, %v1503_v18  ;;  %v409_v26 = vadd.f32 0.5, %v377_v1  ;;  %v332_v43 = vmul.f32 0.5, %v1652_v54  ;;  %v333_v37 = vmul.f32 0.5, %v1655_v36 }
  0xc4   :  { %v1105_v22 = vpack.c.bf16 %v442_v38, %v1593_v62  ;;  %v437_v20 = vmul.f32 %v405_v16, %v1459_v49  ;;  %v334_v3 = vmul.f32 0.5, %v1657_v23  ;;  %1195 = vtanh.f32 %v331_v52 }
  0xc5   :  { %v1091_v58 = vpack.c.bf16 %v439_v14, %v1596_v29  ;;  %v441_v44 = vmul.f32 %v409_v26, %v1506_v19  ;;  %1197 = vtanh.f32 %v332_v43  ;;  %v444_v18 = vmul.f32 %v412_v34, %v1549_v10  ;;  %v1999_v43 = vld [vmem:[#allocation4_spill] sm:$0xff] }
  0xc6   :  { %1106 = vmatprep.subr.bf16.mxu1 %v1105_v22  ;;  %1199 = vtanh.f32 %v333_v37  ;;  %v414_v55 = vadd.f32 0.5, %v382_v56  ;;  %v1095_v21 = vpack.c.bf16 %v1617_v17, %v443_v9  ;;  %v413_v41 = vadd.f32 0.5, %v381_v53  ;;  %v2000_v22 = vld [vmem:[#allocation3_spill] sm:$0xff] }
  0xc7   :  { %1092 = vmatpush1.bf16.msra.mxu0 %v1091_v58  ;;  %v1107_v62 = vpack.c.bf16 %v441_v44, %v437_v20  ;;  %1201 = vtanh.f32 %v334_v3  ;;  %v1093_v49 = vpack.c.bf16 %v1607_v6, %v444_v18  ;;  %v1673_v11 = vadd.f32 %v273_v0, %v1609_v45 }
  0xc8   :  { %v446_v29 = vmul.f32 %v414_v55, %v1560_v39  ;;  %v445_v19 = vmul.f32 %v413_v41, %v1552_v24  ;;  %v1678_v10 = vadd.f32 %v273_v0, %v1611_v25  ;;  %v1681_v50 = vadd.f32 %v273_v0, %v1619_v28 }
  0xc9   :  { %v1188_v17 = vpop.eup %1187  ;;  %1108 = vmatpush1.bf16.msra.mxu1 %v1107_v62  ;;  %1094 = vmatprep.subr.bf16.mxu0 %v1093_v49  ;;  %v1684_v53 = vadd.f32 %v273_v0, %v1621_v57  ;;  %v335_v6 = vmul.f32 0.5, %v1673_v11  ;;  %v424_v45 = vadd.f32 0.5, %v1626_v8  ;;  %v426_v47 = vadd.f32 0.5, %v1628_v33 }
  0xca   :  { %v1190_v63 = vpop.eup %1189  ;;  %v1109_v39 = vpack.c.bf16 %v1614_v27, %v446_v29  ;;  %v1111_v24 = vpack.c.bf16 %v1624_v2, %v445_v19  ;;  %v336_v25 = vmul.f32 0.5, %v1678_v10  ;;  %v337_v28 = vmul.f32 0.5, %v1681_v50 }
  0xcb   :  { %v1192_v51 = vpop.eup %1191  ;;  %1096 = vmatpush1.bf16.msra.mxu0 %v1095_v21  ;;  %v338_v46 = vmul.f32 0.5, %v1684_v53  ;;  %1203 = vtanh.f32 %v335_v6  ;;  %v388_v57 = vmul.f32 0.5, %v1190_v63  ;;  %v387_v8 = vmul.f32 0.5, %v1188_v17 }
  0xcc   :  { %v1194_v4 = vpop.eup %1193  ;;  %1110 = vmatprep.subr.bf16.mxu1 %v1109_v39  ;;  %1205 = vtanh.f32 %v336_v25  ;;  %v423_v27 = vadd.f32 0.5, %v1641_v15  ;;  %v389_v34 = vmul.f32 0.5, %v1192_v51  ;;  %v393_v9 = vmul.f32 0.5, %v1602_v7 }
  0xcd   :  { %1112 = vmatpush1.bf16.msra.mxu1 %v1111_v24  ;;  %1207 = vtanh.f32 %v337_v28  ;;  %v420_v2 = vadd.f32 0.5, %v388_v57  ;;  %v390_v56 = vmul.f32 0.5, %v1194_v4  ;;  %v419_v31 = vadd.f32 0.5, %v387_v8 }
  0xce   :  { %v1196_v30 = vpop.eup %1195  ;;  %1209 = vtanh.f32 %v338_v46  ;;  %v421_v13 = vadd.f32 0.5, %v389_v34  ;;  %v456_v12 = vmul.f32 %v424_v45, %v1539_v35  ;;  %v425_v1 = vadd.f32 0.5, %v393_v9  ;;  %v469_v9 = vpop.permute.xlu0 %468 }
  0xcf   :  { %v1198_v32 = vpop.eup %1197  ;;  %v452_v33 = vmul.f32 %v420_v2, %v1634_v5  ;;  %v422_v40 = vadd.f32 0.5, %v390_v56  ;;  %v451_v15 = vmul.f32 %v419_v31, %v1631_v59  ;;  %v455_v16 = vmul.f32 %v423_v27, %v1537_v61  ;;  %v20_v2 = vld [vmem:[%s1988_s2 + $0x30] sm:$0xff]  ;;  %v21_v56 = vld [vmem:[%s1988_s2 + $0x38] sm:$0xff] }
  0xd0   :  { %v1200_v38 = vpop.eup %1199  ;;  %v453_v52 = vmul.f32 %v421_v13, %v1637_v60  ;;  %v458_v37 = vmul.f32 %v426_v47, %v1999_v43  ;;  %v457_v20 = vmul.f32 %v425_v1, %v2000_v22  ;;  %v395_v3 = vmul.f32 0.5, %v1196_v30 }
  0xd1   :  { %v1202_v14 = vpop.eup %1201  ;;  %v1097_v7 = vpack.c.bf16 %v456_v12, %v452_v33  ;;  %v454_v26 = vmul.f32 %v422_v40, %v1639_v42  ;;  %v1099_v5 = vpack.c.bf16 %v455_v16, %v451_v15  ;;  %v396_v58 = vmul.f32 0.5, %v1198_v32  ;;  %v473_v12 = vpop.permute.xlu1 %472 }
  0xd2   :  { %v1115_v0 = vpack.c.bf16 %v457_v20, %v453_v52  ;;  %v397_v59 = vmul.f32 0.5, %v1200_v38  ;;  %v398_v61 = vmul.f32 0.5, %v1202_v14  ;;  %v427_v55 = vadd.f32 0.5, %v395_v3 }
  0xd3   :  { %1098 = vmatprep.subr.bf16.mxu0 %v1097_v7  ;;  %v1113_v35 = vpack.c.bf16 %v458_v37, %v454_v26  ;;  %v428_v41 = vadd.f32 0.5, %v396_v58 }
  0xd4   :  { %1100 = vmatpush1.bf16.msra.mxu0 %v1099_v5  ;;  %v429_v19 = vadd.f32 0.5, %v397_v59  ;;  %v430_v45 = vadd.f32 0.5, %v398_v61  ;;  %v459_v63 = vmul.f32 %v427_v55, %v1649_v48 }
  0xd5   :  { %v1204_v44 = vpop.eup %1203  ;;  %1114 = vmatprep.subr.bf16.mxu1 %v1113_v35  ;;  %v460_v25 = vmul.f32 %v428_v41, %v1652_v54  ;;  %v14_v54 = vld [vmem:[%s1988_s2] sm:$0xff]  ;;  %v477_v58 = vpop.permute.xlu1 %476 }
  0xd6   :  { %v1206_v60 = vpop.eup %1205  ;;  %1116 = vmatpush1.bf16.msra.mxu1 %v1115_v0  ;;  %v399_v18 = vmul.f32 0.5, %v1204_v44  ;;  %v461_v57 = vmul.f32 %v429_v19, %v1655_v36  ;;  %v462_v8 = vmul.f32 %v430_v45, %v1657_v23  ;;  %v2001_v36 = vmov 0.0   ;;  %v15_v23 = vld [vmem:[%s1988_s2 + $0x8] sm:$0xff] }
  0xd7   :  { %v1208_v42 = vpop.eup %1207  ;;  %v400_v21 = vmul.f32 0.5, %v1206_v60 }
  0xd8   :  { %v1210_v62 = vpop.eup %1209  ;;  %v431_v49 = vadd.f32 0.5, %v399_v18  ;;  %v401_v29 = vmul.f32 0.5, %v1208_v42 }
  0xd9   :  { %v432_v17 = vadd.f32 0.5, %v400_v21  ;;  %v402_v6 = vmul.f32 0.5, %v1210_v62 }
  0xda   :  { %v463_v39 = vmul.f32 %v431_v49, %v1673_v11  ;;  %v433_v24 = vadd.f32 0.5, %v401_v29  ;;  %v16_v11 = vld [vmem:[%s1988_s2 + $0x10] sm:$0xff]  ;;  %v481_v49 = vpop.permute.xlu0 %480 }
  0xdb   :  { %v464_v28 = vmul.f32 %v432_v17, %v1678_v10  ;;  %v434_v51 = vadd.f32 0.5, %v402_v6  ;;  %v17_v10 = vld [vmem:[%s1988_s2 + $0x18] sm:$0xff] }
  0xdc   :  { %v1103_v46 = vpack.c.bf16 %v463_v39, %v459_v63  ;;  %v465_v47 = vmul.f32 %v433_v24, %v1681_v50  ;;  %v18_v50 = vld [vmem:[%s1988_s2 + $0x20] sm:$0xff] }
  0xdd   :  { %v1101_v4 = vpack.c.bf16 %v464_v28, %v460_v25  ;;  %v466_v27 = vmul.f32 %v434_v51, %v1684_v53  ;;  %v19_v53 = vld [vmem:[%s1988_s2 + $0x28] sm:$0xff] }
  0xde   :  { %v1119_v34 = vpack.c.bf16 %v465_v47, %v461_v57 }
  0xdf   :  { %1102 = vmatprep.subr.bf16.mxu0 %v1101_v4  ;;  %v1117_v48 = vpack.c.bf16 %v466_v27, %v462_v8  ;;  %v1809_v8 = vpop.permute.xlu1 %484 }
  0xe0   :  { %1104 = vmatpush1.bf16.msra.mxu0 %v1103_v46 }
  0xe1   :  { %1118 = vmatprep.subr.bf16.mxu1 %v1117_v48 }
  0xe2   :  { %1120 = vmatpush1.bf16.msra.mxu1 %v1119_v34 }
  0xe3   :  { %1073 = vmatmul.mubr.msk.f32.vlgmr.msra.gmra.mrb[0].mxu0 %vm499_vm0, %v14_v54 }
  0xe4   :  { %594 = vmatprep.mubr.f32.mxu0 %v2001_v36 }
  0xe5   :  { %1081 = vmatmul.mubr.msk.f32.vlgmr.msra.gmra.mrb[0].mxu1 %vm499_vm0, %v14_v54 }
  0xe6   :  { %707 = vmatprep.mubr.f32.mxu1 %v2001_v36 }
  0xe7   :  { %1074 = vmatmul.mubr.msk.f32.gmra.mrb[2].mxu0 %vm499_vm0, %v15_v23 }
  0xe8   :  { %600 = vmatprep.mubr.f32.mxu0 %v2001_v36 }
  0xe9   :  { %1082 = vmatmul.mubr.msk.f32.gmra.mrb[2].mxu1 %vm499_vm0, %v15_v23 }
  0xea   :  { %713 = vmatprep.mubr.f32.mxu1 %v2001_v36 }
  0xeb   :  { %1075 = vmatmul.mubr.msk.f32.gmra.mrb[4].mxu0 %vm499_vm0, %v16_v11 }
  0xec   :  { %606 = vmatprep.mubr.f32.mxu0 %v2001_v36 }
  0xed   :  { %1083 = vmatmul.mubr.msk.f32.gmra.mrb[4].mxu1 %vm499_vm0, %v16_v11 }
  0xee   :  { %719 = vmatprep.mubr.f32.mxu1 %v2001_v36 }
  0xef   :  { %1076 = vmatmul.mubr.msk.f32.gmra.mrb[6].mxu0 %vm499_vm0, %v17_v10 }
  0xf0   :  { %612 = vmatprep.mubr.f32.mxu0 %v2001_v36 }
  0xf1   :  { %1084 = vmatmul.mubr.msk.f32.gmra.mrb[6].mxu1 %vm499_vm0, %v17_v10 }
  0xf2   :  { %725 = vmatprep.mubr.f32.mxu1 %v2001_v36 }
  0xf3   :  { %1077 = vmatmul.mubr.msk.f32.gmra.mrb[8].mxu0 %vm499_vm0, %v18_v50 }
  0xf4   :  { %618 = vmatprep.mubr.f32.mxu0 %v2001_v36 }
  0xf5   :  { %1085 = vmatmul.mubr.msk.f32.gmra.mrb[8].mxu1 %vm499_vm0, %v18_v50 }
  0xf6   :  { %731 = vmatprep.mubr.f32.mxu1 %v2001_v36 }
  0xf7   :  { %1078 = vmatmul.mubr.msk.f32.gmra.mrb[10].mxu0 %vm499_vm0, %v19_v53 }
  0xf8   :  { %624 = vmatprep.mubr.f32.mxu0 %v2001_v36 }
  0xf9   :  { %1086 = vmatmul.mubr.msk.f32.gmra.mrb[10].mxu1 %vm499_vm0, %v19_v53 }
  0xfa   :  { %737 = vmatprep.mubr.f32.mxu1 %v2001_v36 }
  0xfb   :  { %1079 = vmatmul.mubr.msk.f32.gmra.mrb[12].mxu0 %vm499_vm0, %v20_v2 }
  0xfc   :  { %630 = vmatprep.mubr.f32.mxu0 %v2001_v36 }
  0xfd   :  { %1087 = vmatmul.mubr.msk.f32.gmra.mrb[12].mxu1 %vm499_vm0, %v20_v2 }
  0xfe   :  { %743 = vmatprep.mubr.f32.mxu1 %v2001_v36 }
  0xff   :  { %1080 = vmatmul.mubr.msk.f32.gmra.mrb[14].mxu0 %vm499_vm0, %v21_v56 }
 0x101   :  { %1088 = vmatmul.mubr.msk.f32.gmra.mrb[14].mxu1 %vm499_vm0, %v21_v56 }
 0x1b6   :  { %v590_v30 = vpop.f32.mrb[0].mxu0 }
 0x1b7   :  { %v1766_v31 = vadd.f32 %v590_v30, %v469_v9  ;;  %v592_v13 = vpop.f32.mrb[1].mxu0 }
 0x1b8   :  { %v703_v32 = vpop.f32.mrb[0].mxu1  ;;  %v1768_v33 = vadd.f32 %v592_v13, %v469_v9 }
 0x1b9   :  { %v750_v40 = vmul.f32 0.5, %v1766_v31  ;;  %v1771_v1 = vadd.f32 %v703_v32, %v469_v9  ;;  %v705_v38 = vpop.f32.mrb[1].mxu1 }
 0x1ba   :  { %v751_v15 = vmul.f32 0.5, %v1768_v33  ;;  %v1774_v16 = vadd.f32 %v705_v38, %v469_v9  ;;  %v596_v52 = vpop.f32.mrb[2].mxu0 }
 0x1bb   :  { %1211 = vtanh.f32 %v750_v40  ;;  %v752_v14 = vmul.f32 0.5, %v1771_v1  ;;  %v1777_v7 = vadd.f32 %v596_v52, %v473_v12  ;;  %v598_v26 = vpop.f32.mrb[3].mxu0 }
 0x1bc   :  { %1213 = vtanh.f32 %v751_v15  ;;  %v753_v43 = vmul.f32 0.5, %v1774_v16  ;;  %v709_v37 = vpop.f32.mrb[2].mxu1  ;;  %v1780_v22 = vadd.f32 %v598_v26, %v473_v12 }
 0x1bd   :  { %1215 = vtanh.f32 %v752_v14  ;;  %v754_v20 = vmul.f32 0.5, %v1777_v7  ;;  %v1783_v5 = vadd.f32 %v709_v37, %v473_v12  ;;  %v711_v3 = vpop.f32.mrb[3].mxu1 }
 0x1be   :  { %1217 = vtanh.f32 %v753_v43  ;;  %v755_v35 = vmul.f32 0.5, %v1780_v22  ;;  %v1786_v0 = vadd.f32 %v711_v3, %v473_v12  ;;  %v602_v59 = vpop.f32.mrb[4].mxu0 }
 0x1bf   :  { %1219 = vtanh.f32 %v754_v20  ;;  %v756_v44 = vmul.f32 0.5, %v1783_v5  ;;  %v1789_v61 = vadd.f32 %v602_v59, %v477_v58  ;;  %v604_v60 = vpop.f32.mrb[5].mxu0 }
 0x1c0   :  { %1221 = vtanh.f32 %v755_v35  ;;  %v757_v18 = vmul.f32 0.5, %v1786_v0  ;;  %v715_v55 = vpop.f32.mrb[4].mxu1  ;;  %v1792_v42 = vadd.f32 %v604_v60, %v477_v58  ;;  %v1831_v60 = vpop.permute.xlu1 %492 }
 0x1c1   :  { %1223 = vtanh.f32 %v756_v44  ;;  %v758_v21 = vmul.f32 0.5, %v1789_v61  ;;  %v1795_v41 = vadd.f32 %v715_v55, %v477_v58  ;;  %v717_v62 = vpop.f32.mrb[5].mxu1 }
 0x1c2   :  { %1225 = vtanh.f32 %v757_v18  ;;  %v759_v29 = vmul.f32 0.5, %v1792_v42  ;;  %v1798_v19 = vadd.f32 %v717_v62, %v477_v58  ;;  %v608_v17 = vpop.f32.mrb[6].mxu0 }
 0x1c3   :  { %1227 = vtanh.f32 %v758_v21  ;;  %v760_v6 = vmul.f32 0.5, %v1795_v41  ;;  %v1801_v45 = vadd.f32 %v608_v17, %v481_v49  ;;  %v610_v63 = vpop.f32.mrb[7].mxu0 }
 0x1c4   :  { %1229 = vtanh.f32 %v759_v29  ;;  %v761_v39 = vmul.f32 0.5, %v1798_v19  ;;  %v721_v24 = vpop.f32.mrb[6].mxu1  ;;  %v1804_v25 = vadd.f32 %v610_v63, %v481_v49 }
 0x1c5   :  { %v1212_v28 = vpop.eup %1211  ;;  %1231 = vtanh.f32 %v760_v6  ;;  %v762_v51 = vmul.f32 0.5, %v1801_v45  ;;  %v1807_v46 = vadd.f32 %v721_v24, %v481_v49  ;;  %v723_v57 = vpop.f32.mrb[7].mxu1 }
 0x1c6   :  { %v1214_v47 = vpop.eup %1213  ;;  %v814_v4 = vmul.f32 0.5, %v1212_v28  ;;  %1233 = vtanh.f32 %v761_v39  ;;  %v763_v27 = vmul.f32 0.5, %v1804_v25  ;;  %v1812_v34 = vadd.f32 %v723_v57, %v481_v49  ;;  %v614_v48 = vpop.f32.mrb[8].mxu0 }
 0x1c7   :  { %v1216_v54 = vpop.eup %1215  ;;  %v815_v36 = vmul.f32 0.5, %v1214_v47  ;;  %1235 = vtanh.f32 %v762_v51  ;;  %v764_v23 = vmul.f32 0.5, %v1807_v46  ;;  %v1816_v11 = vadd.f32 %v614_v48, %v1809_v8  ;;  %v616_v10 = vpop.f32.mrb[9].mxu0 }
 0x1c8   :  { %v1218_v50 = vpop.eup %1217  ;;  %v846_v53 = vadd.f32 0.5, %v814_v4  ;;  %v816_v2 = vmul.f32 0.5, %v1216_v54  ;;  %1237 = vtanh.f32 %v763_v27  ;;  %v765_v56 = vmul.f32 0.5, %v1812_v34  ;;  %v727_v9 = vpop.f32.mrb[8].mxu1 }
 0x1c9   :  { %v1220_v30 = vpop.eup %1219  ;;  %v847_v13 = vadd.f32 0.5, %v815_v36  ;;  %v817_v32 = vmul.f32 0.5, %v1218_v50  ;;  %1239 = vtanh.f32 %v764_v23  ;;  %v766_v12 = vmul.f32 0.5, %v1816_v11  ;;  %v729_v40 = vpop.f32.mrb[9].mxu1 }
 0x1ca   :  { %v1222_v38 = vpop.eup %1221  ;;  %v878_v15 = vmul.f32 %v846_v53, %v1766_v31  ;;  %v848_v52 = vadd.f32 0.5, %v816_v2  ;;  %v818_v14 = vmul.f32 0.5, %v1220_v30  ;;  %1241 = vtanh.f32 %v765_v56  ;;  %v1821_v26 = vpop.f32.mrb[10].mxu0 }
 0x1cb   :  { %v1224_v43 = vpop.eup %1223  ;;  %v1824_v37 = vmul.f32 %v847_v13, %v1768_v33  ;;  %v849_v20 = vadd.f32 0.5, %v817_v32  ;;  %v819_v3 = vmul.f32 0.5, %v1222_v38  ;;  %1243 = vtanh.f32 %v766_v12  ;;  %v1826_v35 = vpop.f32.mrb[11].mxu0 }
 0x1cc   :  { %v1226_v58 = vpop.eup %1225  ;;  %v1829_v59 = vmul.f32 %v848_v52, %v1771_v1  ;;  %v850_v44 = vadd.f32 0.5, %v818_v14  ;;  %v820_v31 = vmul.f32 0.5, %v1224_v43  ;;  %v1834_v18 = vadd.f32 %v727_v9, %v1809_v8  ;;  %v1836_v55 = vpop.f32.mrb[10].mxu1 }
 0x1cd   :  { %v1228_v33 = vpop.eup %1227  ;;  %v1839_v21 = vmul.f32 %v849_v20, %v1774_v16  ;;  %v851_v62 = vadd.f32 0.5, %v819_v3  ;;  %v821_v49 = vmul.f32 0.5, %v1226_v58  ;;  %v1842_v29 = vadd.f32 %v616_v10, %v1809_v8  ;;  %v1844_v1 = vpop.f32.mrb[11].mxu1 }
 0x1ce   :  { %v1230_v17 = vpop.eup %1229  ;;  %v1847_v6 = vmul.f32 %v850_v44, %v1777_v7  ;;  %v852_v63 = vadd.f32 0.5, %v820_v31  ;;  %v822_v39 = vmul.f32 0.5, %v1228_v33  ;;  %v768_v24 = vmul.f32 0.5, %v1834_v18  ;;  %v1850_v28 = vpop.f32.mrb[12].mxu0 }
 0x1cf   :  { %v1232_v51 = vpop.eup %1231  ;;  %v1853_v16 = vmul.f32 %v851_v62, %v1780_v22  ;;  %v853_v57 = vadd.f32 0.5, %v821_v49  ;;  %v823_v47 = vmul.f32 0.5, %v1230_v17  ;;  %v767_v4 = vmul.f32 0.5, %v1842_v29  ;;  %v1856_v27 = vpop.f32.mrb[13].mxu0 }
 0x1d0   :  { %v1234_v48 = vpop.eup %1233  ;;  %v1859_v7 = vmul.f32 %v852_v63, %v1783_v5  ;;  %v854_v54 = vadd.f32 0.5, %v822_v39  ;;  %v824_v36 = vmul.f32 0.5, %v1232_v51  ;;  %v489_v23 = vpop.permute.xlu0 %488  ;;  %1245 = vtanh.f32 %v768_v24 }
 0x1d1   :  { %v1861_v10 = vpop.f32.mrb[12].mxu1  ;;  %v1236_v50 = vpop.eup %1235  ;;  %v1864_v22 = vmul.f32 %v853_v57, %v1786_v0  ;;  %v855_v53 = vadd.f32 0.5, %v823_v47  ;;  %v825_v2 = vmul.f32 0.5, %v1234_v48  ;;  %1247 = vtanh.f32 %v767_v4 }
 0x1d2   :  { %v1866_v56 = vpop.f32.mrb[13].mxu1  ;;  %v1238_v9 = vpop.eup %1237  ;;  %v886_v30 = vmul.f32 %v854_v54, %v1789_v61  ;;  %v856_v5 = vadd.f32 0.5, %v824_v36  ;;  %v826_v13 = vmul.f32 0.5, %v1236_v50  ;;  %v1870_v32 = vadd.f32 %v729_v40, %v1809_v8 }
 0x1d3   :  { %v912_v12 = vpop.permute.xlu1 %911  ;;  %v1872_v38 = vpop.f32.mrb[14].mxu0  ;;  %v887_v0 = vmul.f32 %v855_v53, %v1792_v42  ;;  %v857_v14 = vadd.f32 0.5, %v825_v2  ;;  %v827_v43 = vmul.f32 0.5, %v1238_v9  ;;  %v1902_v50 = vadd.f32 %v1826_v35, %v489_v23 }
 0x1d4   :  { %v1240_v52 = vpop.eup %1239  ;;  %v1875_v20 = vmul.f32 %v912_v12, %v878_v15  ;;  %v1877_v3 = vpop.f32.mrb[15].mxu0  ;;  %v888_v61 = vmul.f32 %v856_v5, %v1795_v41  ;;  %v858_v44 = vadd.f32 0.5, %v826_v13  ;;  %v769_v8 = vmul.f32 0.5, %v1870_v32 }
 0x1d5   :  { %v1242_v58 = vpop.eup %1241  ;;  %v828_v31 = vmul.f32 0.5, %v1240_v52  ;;  %v1881_v40 = vpop.f32.mrb[14].mxu1  ;;  %v889_v62 = vmul.f32 %v857_v14, %v1798_v19  ;;  %v859_v49 = vadd.f32 0.5, %v827_v43  ;;  %v943_v17 = vmul.f32 %v912_v12, %v1824_v37 }
 0x1d6   :  { %v1244_v33 = vpop.eup %1243  ;;  %v829_v42 = vmul.f32 0.5, %v1242_v58  ;;  %v1885_v15 = vpop.f32.mrb[15].mxu1  ;;  %v890_v63 = vmul.f32 %v858_v44, %v1801_v45  ;;  %1249 = vtanh.f32 %v769_v8  ;;  %v944_v47 = vmul.f32 %v912_v12, %v1829_v59 }
 0x1d7   :  { %v860_v39 = vadd.f32 0.5, %v828_v31  ;;  %v830_v24 = vmul.f32 0.5, %v1244_v33  ;;  %v1888_v41 = vpop.permute.xlu0 %496  ;;  %v891_v51 = vmul.f32 %v859_v49, %v1804_v25  ;;  %v945_v19 = vmul.f32 %v912_v12, %v1839_v21  ;;  %v920_v54 = vpop.permute.xlu1 %919 }
 0x1d8   :  { %v861_v57 = vadd.f32 0.5, %v829_v42  ;;  %v1895_v37 = vadd.f32 %v1821_v26, %v489_v23  ;;  %v1898_v45 = vadd.f32 %v1836_v55, %v489_v23  ;;  %v1905_v25 = vadd.f32 %v1844_v1, %v489_v23 }
 0x1d9   :  { %v892_v4 = vmul.f32 %v860_v39, %v1807_v46  ;;  %v862_v48 = vadd.f32 0.5, %v830_v24  ;;  %v950_v59 = vmul.f32 %v920_v54, %v886_v30  ;;  %v951_v55 = vmul.f32 %v920_v54, %v887_v0 }
 0x1da   :  { %v893_v36 = vmul.f32 %v861_v57, %v1812_v34  ;;  %v1246_v21 = vpop.eup %1245  ;;  %v770_v26 = vmul.f32 0.5, %v1895_v37  ;;  %v772_v53 = vmul.f32 0.5, %v1898_v45  ;;  %v771_v34 = vmul.f32 0.5, %v1902_v50 }
 0x1db   :  { %v1908_v46 = vmul.f32 %v862_v48, %v1816_v11  ;;  %v916_v2 = vpop.permute.xlu0 %915  ;;  %v1248_v9 = vpop.eup %1247  ;;  %v832_v5 = vmul.f32 0.5, %v1246_v21  ;;  %v773_v35 = vmul.f32 0.5, %v1905_v25  ;;  %v952_v13 = vmul.f32 %v920_v54, %v888_v61 }
 0x1dc   :  { %v831_v1 = vmul.f32 0.5, %v1248_v9  ;;  %1251 = vtanh.f32 %v770_v26  ;;  %v953_v23 = vmul.f32 %v920_v54, %v889_v62  ;;  %v1916_v11 = vadd.f32 %v1850_v28, %v1831_v60 }
 0x1dd   :  { %v864_v30 = vadd.f32 0.5, %v832_v5  ;;  %1253 = vtanh.f32 %v772_v53  ;;  %v1920_v12 = vadd.f32 %v1861_v10, %v1831_v60  ;;  %v946_v52 = vmul.f32 %v916_v2, %v1847_v6 }
 0x1de   :  { %v863_v0 = vadd.f32 0.5, %v831_v1  ;;  %1255 = vtanh.f32 %v771_v34  ;;  %v774_v14 = vmul.f32 0.5, %v1916_v11  ;;  %v947_v43 = vmul.f32 %v916_v2, %v1853_v16 }
 0x1df   :  { %v1926_v58 = vmul.f32 %v864_v30, %v1834_v18  ;;  %1257 = vtanh.f32 %v773_v35  ;;  %v776_v28 = vmul.f32 0.5, %v1920_v12  ;;  %v948_v61 = vmul.f32 %v916_v2, %v1859_v7  ;;  %v924_v18 = vpop.permute.xlu1 %923 }
 0x1e0   :  { %v1250_v44 = vpop.eup %1249  ;;  %v1931_v10 = vmul.f32 %v863_v0, %v1842_v29  ;;  %1259 = vtanh.f32 %v774_v14  ;;  %v949_v6 = vmul.f32 %v916_v2, %v1864_v22  ;;  %v974_v31 = vadd.f32 %v946_v52, %v1875_v20  ;;  %v928_v2 = vpop.permute.xlu0 %927 }
 0x1e1   :  { %v833_v8 = vmul.f32 0.5, %v1250_v44  ;;  %1261 = vtanh.f32 %v776_v28  ;;  %v987_v16 = vadd.f32 %v947_v43, %v943_v17  ;;  %v1000_v33 = vadd.f32 %v948_v61, %v944_v47 }
 0x1e2   :  { %v1013_v62 = vadd.f32 %v949_v6, %v945_v19  ;;  %v1937_v49 = vadd.f32 %v1856_v27, %v1831_v60  ;;  %v1941_v7 = vadd.f32 %v1866_v56, %v1831_v60  ;;  %v954_v29 = vmul.f32 %v924_v18, %v890_v63 }
 0x1e3   :  { %v865_v42 = vadd.f32 0.5, %v833_v8  ;;  %v955_v39 = vmul.f32 %v924_v18, %v891_v51  ;;  %v956_v22 = vmul.f32 %v924_v18, %v892_v4  ;;  %v957_v24 = vmul.f32 %v924_v18, %v893_v36 }
 0x1e4   :  { %v775_v20 = vmul.f32 0.5, %v1937_v49  ;;  %v777_v17 = vmul.f32 0.5, %v1941_v7  ;;  %v975_v57 = vadd.f32 %v974_v31, %v950_v59  ;;  %v988_v47 = vadd.f32 %v987_v16, %v951_v55 }
 0x1e5   :  { %v897_v19 = vmul.f32 %v865_v42, %v1870_v32  ;;  %v1001_v48 = vadd.f32 %v1000_v33, %v952_v13  ;;  %v1014_v27 = vadd.f32 %v1013_v62, %v953_v23  ;;  %v1948_v54 = vadd.f32 %v1872_v38, %v1888_v41 }
 0x1e6   :  { %v1252_v60 = vpop.eup %1251  ;;  %1263 = vtanh.f32 %v775_v20  ;;  %v976_v56 = vadd.f32 %v975_v57, %v954_v29  ;;  %v989_v63 = vadd.f32 %v988_v47, %v955_v39  ;;  %v1952_v51 = vadd.f32 %v1881_v40, %v1888_v41 }
 0x1e7   :  { %v1254_v4 = vpop.eup %1253  ;;  %v834_v36 = vmul.f32 0.5, %v1252_v60  ;;  %1265 = vtanh.f32 %v777_v17  ;;  %v1002_v59 = vadd.f32 %v1001_v48, %v956_v22  ;;  %v1015_v21 = vadd.f32 %v1014_v27, %v957_v24  ;;  %v936_v22 = vpop.permute.xlu0 %935 }
 0x1e8   :  { %v1256_v32 = vpop.eup %1255  ;;  %v836_v26 = vmul.f32 0.5, %v1254_v4  ;;  %v778_v53 = vmul.f32 0.5, %v1948_v54  ;;  %v780_v38 = vmul.f32 0.5, %v1952_v51  ;;  %v1958_v55 = vadd.f32 %v1877_v3, %v1888_v41 }
 0x1e9   :  { %v1258_v9 = vpop.eup %1257  ;;  %v866_v5 = vadd.f32 0.5, %v834_v36  ;;  %v835_v40 = vmul.f32 0.5, %v1256_v32  ;;  %v1962_v34 = vadd.f32 %v1885_v15, %v1888_v41  ;;  %v958_v35 = vmul.f32 %v928_v2, %v1908_v46  ;;  %v932_v15 = vpop.permute.xlu1 %931 }
 0x1ea   :  { %v1260_v13 = vpop.eup %1259  ;;  %v868_v1 = vadd.f32 0.5, %v836_v26  ;;  %v837_v23 = vmul.f32 0.5, %v1258_v9  ;;  %1267 = vtanh.f32 %v778_v53  ;;  %v779_v30 = vmul.f32 0.5, %v1958_v55 }
 0x1eb   :  { %v1262_v52 = vpop.eup %1261  ;;  %v898_v3 = vmul.f32 %v866_v5, %v1895_v37  ;;  %v867_v0 = vadd.f32 0.5, %v835_v40  ;;  %v838_v14 = vmul.f32 0.5, %v1260_v13  ;;  %1269 = vtanh.f32 %v780_v38 }
 0x1ec   :  { %v900_v43 = vmul.f32 %v868_v1, %v1898_v45  ;;  %v869_v28 = vadd.f32 0.5, %v837_v23  ;;  %v840_v61 = vmul.f32 0.5, %v1262_v52  ;;  %1271 = vtanh.f32 %v779_v30 }
 0x1ed   :  { %v899_v41 = vmul.f32 %v867_v0, %v1902_v50  ;;  %v870_v46 = vadd.f32 0.5, %v838_v14  ;;  %v781_v44 = vmul.f32 0.5, %v1962_v34  ;;  %v962_v6 = vmul.f32 %v932_v15, %v898_v3 }
 0x1ee   :  { %v901_v31 = vmul.f32 %v869_v28, %v1905_v25  ;;  %v872_v8 = vadd.f32 0.5, %v840_v61  ;;  %v964_v16 = vmul.f32 %v932_v15, %v900_v43  ;;  %v959_v37 = vmul.f32 %v928_v2, %v1931_v10 }
 0x1ef   :  { %v902_v33 = vmul.f32 %v870_v46, %v1916_v11  ;;  %1273 = vtanh.f32 %v781_v44  ;;  %v963_v45 = vmul.f32 %v932_v15, %v899_v41  ;;  %v960_v18 = vmul.f32 %v928_v2, %v1926_v58 }
 0x1f0   :  { %v1264_v62 = vpop.eup %1263  ;;  %v904_v29 = vmul.f32 %v872_v8, %v1920_v12  ;;  %v965_v50 = vmul.f32 %v932_v15, %v901_v31  ;;  %v961_v42 = vmul.f32 %v928_v2, %v897_v19  ;;  %v977_v39 = vadd.f32 %v976_v56, %v958_v35 }
 0x1f1   :  { %v1266_v24 = vpop.eup %1265  ;;  %v839_v20 = vmul.f32 0.5, %v1264_v62  ;;  %v990_v25 = vadd.f32 %v989_v63, %v959_v37  ;;  %v1003_v17 = vadd.f32 %v1002_v59, %v960_v18  ;;  %v966_v57 = vmul.f32 %v936_v22, %v902_v33 }
 0x1f2   :  { %v841_v47 = vmul.f32 0.5, %v1266_v24  ;;  %v1016_v10 = vadd.f32 %v1015_v21, %v961_v42  ;;  %v968_v48 = vmul.f32 %v936_v22, %v904_v29  ;;  %v978_v11 = vadd.f32 %v977_v39, %v962_v6  ;;  %v1028_v24 = vpop.permute.xlu0 %1027 }
 0x1f3   :  { %v871_v27 = vadd.f32 0.5, %v839_v20  ;;  %v991_v60 = vadd.f32 %v990_v25, %v963_v45  ;;  %v1004_v4 = vadd.f32 %v1003_v17, %v964_v16  ;;  %v1282_v29 = vmov 1966171168  }
 0x1f4   :  { %v1268_v58 = vpop.eup %1267  ;;  %v873_v36 = vadd.f32 0.5, %v841_v47  ;;  %v979_v32 = vadd.f32 %v978_v11, %v966_v57  ;;  %v1017_v12 = vadd.f32 %v1016_v10, %v965_v50  ;;  %v1041_v50 = vunpack.c.l.s4 %v1282_v29 }
 0x1f5   :  { %v1270_v26 = vpop.eup %1269  ;;  %v903_v19 = vmul.f32 %v871_v27, %v1937_v49  ;;  %v842_v56 = vmul.f32 0.5, %v1268_v58  ;;  %v1005_v53 = vadd.f32 %v1004_v4, %v968_v48  ;;  %v940_v49 = vpop.permute.xlu1 %939  ;;  %v2002_v58 = vld [vmem:[#allocation2_spill] sm:$0xff] }
 0x1f6   :  { %v1272_v38 = vpop.eup %1271  ;;  %v905_v63 = vmul.f32 %v873_v36, %v1941_v7  ;;  %v844_v59 = vmul.f32 0.5, %v1270_v26  ;;  %v1042_v47 = vunpack.c.0.s8 %v1041_v50 }
 0x1f7   :  { %v874_v2 = vadd.f32 0.5, %v842_v56  ;;  %v843_v21 = vmul.f32 0.5, %v1272_v38  ;;  %v967_v9 = vmul.f32 %v936_v22, %v903_v19 }
 0x1f8   :  { %v876_v5 = vadd.f32 0.5, %v844_v59  ;;  %v969_v40 = vmul.f32 %v936_v22, %v905_v63  ;;  %v1045_v36 = vsub.s32 %v1042_v47, %v2002_v58  ;;  %v2003_v59 = vlaneseq }
 0x1f9   :  { %v1274_v35 = vpop.eup %1273  ;;  %v906_v13 = vmul.f32 %v874_v2, %v1948_v54  ;;  %v875_v1 = vadd.f32 0.5, %v843_v21  ;;  %v992_v23 = vadd.f32 %v991_v60, %v967_v9 }
 0x1fa   :  { %v908_v30 = vmul.f32 %v876_v5, %v1952_v51  ;;  %v845_v52 = vmul.f32 0.5, %v1274_v35  ;;  %v1018_v3 = vadd.f32 %v1017_v12, %v969_v40  ;;  %vm1065_vm1 = vcmp.lt.s32.totalorder %v2003_v59, 512 }
 0x1fb   :  { %v907_v0 = vmul.f32 %v875_v1, %v1958_v55  ;;  %v970_v14 = vmul.f32 %v940_v49, %v906_v13 }
 0x1fc   :  { %v877_v7 = vadd.f32 0.5, %v845_v52  ;;  %v972_v43 = vmul.f32 %v940_v49, %v908_v30 }
 0x1fd   :  { %v971_v28 = vmul.f32 %v940_v49, %v907_v0  ;;  %v980_v61 = vadd.f32 %v979_v32, %v970_v14 }
 0x1fe   :  { %v909_v15 = vmul.f32 %v877_v7, %v1962_v34  ;;  %v1006_v41 = vadd.f32 %v1005_v53, %v972_v43 }
 0x1ff   :  { %v993_v46 = vadd.f32 %v992_v23, %v971_v28  ;;  %v981_v44 = vrot.slane %v980_v61, 4 }
 0x200   :  { %v973_v54 = vmul.f32 %v940_v49, %v909_v15  ;;  %v1007_v6 = vrot.slane %v1006_v41, 4 }
 0x201   :  { %v982_v31 = vadd.f32 %v981_v44, %v980_v61  ;;  %v994_v8 = vrot.slane %v993_v46, 4 }
 0x202   :  { %v1019_v51 = vadd.f32 %v1018_v3, %v973_v54  ;;  %v1008_v16 = vadd.f32 %v1007_v6, %v1006_v41 }
 0x203   :  { %v983_v37 = vrot.slane %v982_v31, 2  ;;  %v995_v33 = vadd.f32 %v994_v8, %v993_v46 }
 0x204   :  { %v1009_v45 = vrot.slane %v1008_v16, 2  ;;  %v1020_v55 = vrot.slane %v1019_v51, 4 }
 0x205   :  { %v984_v18 = vadd.f32 %v983_v37, %v982_v31  ;;  %v996_v62 = vrot.slane %v995_v33, 2 }
 0x206   :  { %v1010_v42 = vadd.f32 %v1009_v45, %v1008_v16  ;;  %v1021_v39 = vadd.f32 %v1020_v55, %v1019_v51 }
 0x207   :  { %v985_v34 = vrot.slane %v984_v18, 1  ;;  %v997_v22 = vadd.f32 %v996_v62, %v995_v33 }
 0x208   :  { %v1011_v20 = vrot.slane %v1010_v42, 1  ;;  %v1022_v25 = vrot.slane %v1021_v39, 2 }
 0x209   :  { %v986_v17 = vadd.f32 %v985_v34, %v984_v18  ;;  %v998_v57 = vrot.slane %v997_v22, 1 }
 0x20a   :  { %v1012_v10 = vadd.f32 %v1011_v20, %v1010_v42  ;;  %v1023_v48 = vadd.f32 %v1022_v25, %v1021_v39 }
 0x20b   :  { %v999_v11 = vadd.f32 %v998_v57, %v997_v22  ;;  %v1030_v27 = vadd.f32 %v1028_v24, %v986_v17 }
 0x20c   :  { %v1024_v60 = vrot.slane %v1023_v48, 1  ;;  %v1032_v12 = vadd.f32 %v1028_v24, %v1012_v10 }
 0x20d   :  { %v1031_v4 = vadd.f32 %v1028_v24, %v999_v11 }
 0x20e   :  { %v1025_v32 = vadd.f32 %v1024_v60, %v1023_v48 }
 0x20f   :  { %v1038_v26 = vcombine.low %v1030_v27, %v1031_v4 }
 0x210   :  { %v1033_v19 = vadd.f32 %v1028_v24, %v1025_v32 }
 0x211   :  { %v1046_v53 = vrot.slane %v1038_v26, %v1045_v36 }
 0x212   :  { %v1039_v56 = vcombine.low %v1032_v12, %v1033_v19 }
 0x214   :  { %v1053_v38 = vrot.slane %v1039_v56, %v1045_v36 }
 0x216   :  { %v1054_v63 = vcombine.low %v1046_v53, %v1053_v38 }
 0x218   :  { %v1061_v2 = vrot.slane %v1054_v63, %v1045_v36 }
 0x21a   :  { %1067 = vst.msk [vmem:[%s1989_s3] sm:$0xf] %vm1065_vm1, %v1061_v2 }

</bundles_post_ra>
